<compile_context>
chip_gen: v6e
topology: v6e:2x2x1
jax: 0.10.0
libtpu: 0.0.40
codegen_flags: <defaults>
</compile_context>

<pallas_src>
import functools

import jax
import jax.numpy as jnp
from jax import lax
from jax.experimental import pallas as pl
from jax.experimental.pallas import tpu as pltpu


BN_EPS = 1e-5
TILE_M_TARGET = 512              # rows per M tile (amortizes per-grid-step overhead)


def _detect_chip():
    """Chip-aware defaults: megacore split only on v7x, VMEM budget from HW info."""
    kind = ""
    try:
        kind = jax.devices()[0].device_kind.lower()
    except Exception:
        pass
    ncores = 2 if "v7" in kind else 1            # v5e/v6e have a single TensorCore
    cap = 64 * 1024 * 1024                       # conservative default (v7x floor)
    if kind and "v7" not in kind:
        cap = 128 * 1024 * 1024                  # v5e/v6e physical VMEM
    try:
        cap = int(getattr(pltpu.get_tpu_info(), "vmem_capacity_bytes", cap))
    except Exception:
        pass
    return ncores, cap


_NCORES, _VMEM_CAP = _detect_chip()
_VMEM_LIMIT = max(32 * 1024 * 1024, min(int(_VMEM_CAP * 7 // 8), 100 * 1024 * 1024))
_FUSED_SLAB_BUDGET = int(_VMEM_CAP * 0.55)       # headroom for pipeline buffers / compiler scratch


# ----------------------------------------------------------------------------
# Pallas kernels
# ----------------------------------------------------------------------------
def fused_conv_bn_act_kernel(p_ref, w_ref, gamma_ref, beta_ref, o_ref, sum_sc, ssq_sc,
                             *, tile_m, n_tiles, count, eps, neg_slope):
    """Conv matmul tiles accumulated into a VMEM-resident output slab + per-channel
    batch stats; at the last grid step BN affine + (Leaky)ReLU is applied in place,
    so the full tensor is written to HBM exactly once."""
    i = pl.program_id(0)

    @pl.when(i == 0)
    def _():
        sum_sc[...] = jnp.zeros_like(sum_sc)
        ssq_sc[...] = jnp.zeros_like(ssq_sc)

    acc = jnp.dot(p_ref[...], w_ref[...], preferred_element_type=jnp.float32)
    row0 = pl.multiple_of(i * tile_m, tile_m)
    o_ref[pl.ds(row0, tile_m), :] = acc

    sum_sc[...] += jnp.sum(acc, axis=0, keepdims=True)
    ssq_sc[...] += jnp.sum(acc * acc, axis=0, keepdims=True)

    @pl.when(i == n_tiles - 1)
    def _():
        inv_count = 1.0 / count
        mean = sum_sc[...] * inv_count
        var = jnp.maximum(ssq_sc[...] * inv_count - mean * mean, 0.0)
        scale = gamma_ref[...] * lax.rsqrt(var + eps)
        shift = beta_ref[...] - mean * scale

        def body(t, carry):
            r0 = pl.multiple_of(t * tile_m, tile_m)
            y = o_ref[pl.ds(r0, tile_m), :] * scale + shift
            o_ref[pl.ds(r0, tile_m), :] = jnp.where(y > 0, y, neg_slope * y)
            return carry

        lax.fori_loop(0, n_tiles, body, 0)


def conv_stats_kernel(p_ref, w_ref, out_ref, stats_ref, sum_sc, ssq_sc):
    """Fallback kernel A: one (tile_m, K) x (K, Cpad) MXU matmul tile (bf16 store)
    plus per-channel sum / sum-of-squares accumulated in VMEM scratch."""
    i = pl.program_id(1)   # per-core M-tile loop ("arbitrary" axis)

    @pl.when(i == 0)
    def _():
        sum_sc[...] = jnp.zeros_like(sum_sc)
        ssq_sc[...] = jnp.zeros_like(ssq_sc)

    acc = jnp.dot(p_ref[...], w_ref[...], preferred_element_type=jnp.float32)
    out_ref[...] = acc.astype(out_ref.dtype)       # bf16: halves conv_out HBM traffic

    sum_sc[...] += jnp.sum(acc, axis=0, keepdims=True)
    ssq_sc[...] += jnp.sum(acc * acc, axis=0, keepdims=True)

    @pl.when(i == pl.num_programs(1) - 1)
    def _():
        stats_ref[...] = jnp.zeros_like(stats_ref)
        stats_ref[0, 0:1, :] = sum_sc[...]
        stats_ref[0, 1:2, :] = ssq_sc[...]


def bn_act_kernel(x_ref, scale_ref, shift_ref, o_ref, *, neg_slope):
    """Fallback kernel B: BN affine + (Leaky)ReLU on bf16, in place (aliased)."""
    y = x_ref[...].astype(jnp.float32) * scale_ref[...] + shift_ref[...]
    o_ref[...] = jnp.where(y > 0, y, neg_slope * y).astype(o_ref.dtype)


# ----------------------------------------------------------------------------
# Glue helpers (parameter setup / layout plumbing)
# ----------------------------------------------------------------------------
def _round_up(x, m):
    return ((x + m - 1) // m) * m


def _plan_m(m, ncores):
    """Pick an M tile and padded M so m_pad = ncores * tiles_per_core * tile_m."""
    per_core = -(-m // ncores)
    tile_m = min(TILE_M_TARGET, _round_up(per_core, 16))
    tiles_per_core = -(-per_core // tile_m)
    return tile_m, tiles_per_core, ncores * tiles_per_core * tile_m


def spectral_normalize(w, u, dim, n_power_iterations=1, eps=1e-12):
    """PyTorch-style spectral norm: W / sigma, sigma from power iteration."""
    if dim != 0:
        perm = (dim,) + tuple(i for i in range(w.ndim) if i != dim)
        wm = jnp.transpose(w, perm)
    else:
        wm = w
    wm = wm.reshape(wm.shape[0], -1)

    def _l2(v):
        return v / (jnp.linalg.norm(v) + eps)

    v = None
    for _ in range(n_power_iterations):
        v = _l2(wm.T @ u)
        u = _l2(wm @ v)
    sigma = u @ (wm @ v)
    return w / sigma


def im2col(xp, kh, kw, stride):
    """xp: (N, C, Hp, Wp) -> patches (N*Ho*Wo, C*kh*kw), ordering matches OIHW flatten."""
    n, c, hp, wp = xp.shape
    ho = (hp - kh) // stride + 1
    wo = (wp - kw) // stride + 1
    cols = []
    for i in range(kh):
        for j in range(kw):
            cols.append(xp[:, :, i:i + stride * ho:stride, j:j + stride * wo:stride])
    patches = jnp.stack(cols, axis=2)                      # (N, C, kh*kw, Ho, Wo)
    patches = patches.transpose(0, 3, 4, 1, 2)             # (N, Ho, Wo, C, kh*kw)
    patches = patches.reshape(n * ho * wo, c * kh * kw)
    return patches, ho, wo


def init_params(key, in_channels, out_channels, dtype):
    kw_key, ku_key = jax.random.split(key)
    if dtype in ("down", "in"):
        k = 4 if dtype == "down" else 3
        w = jax.random.normal(kw_key, (out_channels, in_channels, k, k), jnp.float32) * 0.1
    else:  # 'up' -> ConvTranspose2d weight layout (Cin, Cout, 4, 4), SN dim=1
        w = jax.random.normal(kw_key, (in_channels, out_channels, 4, 4), jnp.float32) * 0.1
    u = jax.random.normal(ku_key, (out_channels,), jnp.float32)
    u = u / (jnp.linalg.norm(u) + 1e-12)
    return {
        "w": w,
        "u": u,
        "gamma": jnp.ones((out_channels,), jnp.float32),   # BatchNorm2d init
        "beta": jnp.zeros((out_channels,), jnp.float32),
    }


# ----------------------------------------------------------------------------
# GenUnit forward
# ----------------------------------------------------------------------------
@functools.partial(jax.jit, static_argnames=("dtype", "activation", "force_two_pass"))
def gen_unit_forward(x, w, u, gamma, beta, *, dtype, activation="relu",
                     force_two_pass=False):
    assert dtype in ("down", "up", "in")
    assert activation in ("relu", "leaky")

    sn_dim = 0 if dtype in ("down", "in") else 1
    w = spectral_normalize(w, u, dim=sn_dim)

    if dtype == "down":       # Conv2d(Cin, Cout, 4, 2, 1, bias=False, padding_mode='reflect')
        xp = jnp.pad(x, ((0, 0), (0, 0), (1, 1), (1, 1)), mode="reflect")
        kh = kw = 4
        stride = 2
        c_out = w.shape[0]
        w_mat = w.reshape(c_out, -1).T
    elif dtype == "in":       # Conv2d(Cin, Cout, 3, 1, 1, bias=False, padding_mode='reflect')
        xp = jnp.pad(x, ((0, 0), (0, 0), (1, 1), (1, 1)), mode="reflect")
        kh = kw = 3
        stride = 1
        c_out = w.shape[0]
        w_mat = w.reshape(c_out, -1).T
    else:                     # ConvTranspose2d(Cin, Cout, 4, 2, 1, bias=False)
        # TODO(synk): 4-way sub-pixel decomposition would avoid the structural zeros.
        n0, c0, h0, w0 = x.shape
        xd = jnp.zeros((n0, c0, 2 * h0 - 1, 2 * w0 - 1), x.dtype)
        xd = xd.at[:, :, ::2, ::2].set(x)                      # stride-2 zero dilation
        xp = jnp.pad(xd, ((0, 0), (0, 0), (2, 2), (2, 2)))     # pad by k-1-p = 2
        kh = kw = 4
        stride = 1
        w_conv = jnp.flip(w, axis=(2, 3)).transpose(1, 0, 2, 3)  # (Cout, Cin, 4, 4)
        c_out = w_conv.shape[0]
        w_mat = w_conv.reshape(c_out, -1).T

    # TODO(synk): in-kernel shifted-matmul patch extraction (avoid kh*kw HBM duplication).
    patches, ho, wo = im2col(xp, kh, kw, stride)
    n = x.shape[0]
    m, k = patches.shape

    # Lane/MXU-friendly padding: Cout and K -> multiples of 128 lanes (lane-dense
    # loads/stores, no masked vregs); zero padding keeps the matmul/stats exact.
    k_pad = _round_up(k, 128)
    c_pad = _round_up(c_out, 128)

    neg_slope = 0.0 if activation == "relu" else 0.2
    gamma_p = jnp.pad(gamma, (0, c_pad - c_out)).reshape(1, c_pad)
    beta_p = jnp.pad(beta, (0, c_pad - c_out)).reshape(1, c_pad)
    w_mat_p = jnp.pad(w_mat, ((0, k_pad - k), (0, c_pad - c_out))).astype(jnp.bfloat16)

    # Fused path feasibility: resident f32 slab + double-buffered bf16 inputs in VMEM.
    tile_m1, n_tiles1, m_pad1 = _plan_m(m, 1)
    fused_bytes = (m_pad1 * c_pad * 4
                   + 2 * tile_m1 * k_pad * 2
                   + 2 * k_pad * c_pad * 2
                   + 6 * c_pad * 4)
    use_fused = (not force_two_pass) and (fused_bytes <= _FUSED_SLAB_BUDGET)

    if use_fused:
        # --- Single fused kernel: matmul + stats + BN + act; one HBM write ---
        tile_m, n_tiles, m_pad = tile_m1, n_tiles1, m_pad1
        patches_p = jnp.pad(patches, ((0, m_pad - m), (0, k_pad - k))).astype(jnp.bfloat16)
        y = pl.pallas_call(
            functools.partial(fused_conv_bn_act_kernel,
                              tile_m=tile_m, n_tiles=n_tiles,
                              count=float(m), eps=BN_EPS, neg_slope=neg_slope),
            grid=(n_tiles,),
            in_specs=[
                pl.BlockSpec((tile_m, k_pad), lambda i: (i, 0)),
                pl.BlockSpec((k_pad, c_pad), lambda i: (0, 0)),
                pl.BlockSpec((1, c_pad), lambda i: (0, 0)),
                pl.BlockSpec((1, c_pad), lambda i: (0, 0)),
            ],
            out_specs=pl.BlockSpec((m_pad, c_pad), lambda i: (0, 0)),   # VMEM-resident slab
            out_shape=jax.ShapeDtypeStruct((m_pad, c_pad), jnp.float32),
            scratch_shapes=[
                pltpu.VMEM((1, c_pad), jnp.float32),   # per-channel sum
                pltpu.VMEM((1, c_pad), jnp.float32),   # per-channel sum of squares
            ],
            compiler_params=pltpu.CompilerParams(
                dimension_semantics=("arbitrary",),
                vmem_limit_bytes=_VMEM_LIMIT,
            ),
        )(patches_p, w_mat_p, gamma_p, beta_p)
    else:
        # --- Fallback: two kernels, bf16 conv_out round-trip ---
        tile_m, tiles_per_core, m_pad = _plan_m(m, _NCORES)
        patches_p = jnp.pad(patches, ((0, m_pad - m), (0, k_pad - k))).astype(jnp.bfloat16)

        conv_out, stats = pl.pallas_call(
            conv_stats_kernel,
            grid=(_NCORES, tiles_per_core),
            in_specs=[
                pl.BlockSpec((tile_m, k_pad), lambda c, i: (c * tiles_per_core + i, 0)),
                pl.BlockSpec((k_pad, c_pad), lambda c, i: (0, 0)),
            ],
            out_specs=[
                pl.BlockSpec((tile_m, c_pad), lambda c, i: (c * tiles_per_core + i, 0)),
                pl.BlockSpec((1, 8, c_pad), lambda c, i: (c, 0, 0)),
            ],
            out_shape=(
                jax.ShapeDtypeStruct((m_pad, c_pad), jnp.bfloat16),
                jax.ShapeDtypeStruct((_NCORES, 8, c_pad), jnp.float32),
            ),
            scratch_shapes=[
                pltpu.VMEM((1, c_pad), jnp.float32),
                pltpu.VMEM((1, c_pad), jnp.float32),
            ],
            compiler_params=pltpu.CompilerParams(
                dimension_semantics=("parallel", "arbitrary"),
                vmem_limit_bytes=_VMEM_LIMIT,
            ),
        )(patches_p, w_mat_p)

        # BatchNorm2d (training mode): biased batch stats over (N, H, W); padded
        # rows/channels are zero, count uses the real row count.
        count = jnp.float32(m)
        total = stats[:, 0, :].sum(axis=0)
        total_sq = stats[:, 1, :].sum(axis=0)
        mean = total / count
        var = jnp.maximum(total_sq / count - mean * mean, 0.0)
        scale = gamma_p / jnp.sqrt(var + BN_EPS)           # (1, c_pad)
        shift = beta_p - mean * scale                      # (1, c_pad)

        # Larger row tile for the pure mem-bound BN+act pass.
        tile_b = tile_m
        while m_pad % (tile_b * 2) == 0 and tile_b * 2 <= 2048:
            tile_b *= 2

        y = pl.pallas_call(
            functools.partial(bn_act_kernel, neg_slope=neg_slope),
            grid=(m_pad // tile_b,),
            in_specs=[
                pl.BlockSpec((tile_b, c_pad), lambda i: (i, 0)),
                pl.BlockSpec((1, c_pad), lambda i: (0, 0)),
                pl.BlockSpec((1, c_pad), lambda i: (0, 0)),
            ],
            out_specs=pl.BlockSpec((tile_b, c_pad), lambda i: (i, 0)),
            out_shape=jax.ShapeDtypeStruct((m_pad, c_pad), jnp.bfloat16),
            input_output_aliases={0: 0},                    # in-place over conv_out (bf16 == bf16)
            compiler_params=pltpu.CompilerParams(
                dimension_semantics=("parallel",),
                vmem_limit_bytes=_VMEM_LIMIT,
            ),
        )(conv_out, scale, shift)

    # strip padding, rows -> NCHW, f32 output (matches the PyTorch module)
    return (y[:m, :c_out].astype(jnp.float32)
            .reshape(n, ho, wo, c_out).transpose(0, 3, 1, 2))


# ----------------------------------------------------------------------------
# Pure-JAX reference (for correctness check)
# ----------------------------------------------------------------------------
def reference_forward(x, params, dtype, activation="relu", eps=1e-5):
    sn_dim = 0 if dtype in ("down", "in") else 1
    w = spectral_normalize(params["w"], params["u"], dim=sn_dim)
    dn = ("NCHW", "OIHW", "NCHW")
    if dtype == "down":
        xp = jnp.pad(x, ((0, 0), (0, 0), (1, 1), (1, 1)), mode="reflect")
        out = lax.conv_general_dilated(xp, w, (2, 2), "VALID", dimension_numbers=dn,
                                       precision=lax.Precision.HIGHEST)
    elif dtype == "in":
        xp = jnp.pad(x, ((0, 0), (0, 0), (1, 1), (1, 1)), mode="reflect")
        out = lax.conv_general_dilated(xp, w, (1, 1), "VALID", dimension_numbers=dn,
                                       precision=lax.Precision.HIGHEST)
    else:
        w_conv = jnp.flip(w, axis=(2, 3)).transpose(1, 0, 2, 3)
        out = lax.conv_general_dilated(x, w_conv, (1, 1), ((2, 2), (2, 2)),
                                       lhs_dilation=(2, 2), dimension_numbers=dn,
                                       precision=lax.Precision.HIGHEST)
    mean = out.mean(axis=(0, 2, 3))
    var = out.var(axis=(0, 2, 3))
    xn = (out - mean[None, :, None, None]) / jnp.sqrt(var + eps)[None, :, None, None]
    y = xn * params["gamma"][None, :, None, None] + params["beta"][None, :, None, None]
    neg = 0.0 if activation == "relu" else 0.2
    return jnp.where(y > 0, y, neg * y)


# ----------------------------------------------------------------------------
if __name__ == "__main__":
    key = jax.random.PRNGKey(0)
    kx, kp = jax.random.split(key)

    in_channels, out_channels = 4, 8
    x = jax.random.normal(kx, (2, in_channels, 16, 16), jnp.float32)

    expected_hw = {"down": 8, "in": 16, "up": 32}
    for dt, act in (("down", "relu"), ("in", "leaky"), ("up", "relu")):
        params = init_params(kp, in_channels, out_channels, dt)
        y = gen_unit_forward(x, params["w"], params["u"], params["gamma"], params["beta"],
                             dtype=dt, activation=act)
        y = jax.block_until_ready(y)
        assert y.shape == (2, out_channels, expected_hw[dt], expected_hw[dt]), y.shape
        y_ref = reference_forward(x, params, dt, act)
        err = float(jnp.max(jnp.abs(y - y_ref)))
        # bf16 matmul inputs (f32 accumulation) -> slightly looser tolerance than pure f32
        assert jnp.allclose(y, y_ref, atol=3e-2, rtol=3e-2), (dt, err)

    # Also exercise the two-pass fallback (bf16 conv_out round-trip) once.
    params = init_params(kp, in_channels, out_channels, "in")
    y2 = gen_unit_forward(x, params["w"], params["u"], params["gamma"], params["beta"],
                          dtype="in", activation="relu", force_two_pass=True)
    y2 = jax.block_until_ready(y2)
    y2_ref = reference_forward(x, params, "in", "relu")
    err2 = float(jnp.max(jnp.abs(y2 - y2_ref)))
    assert jnp.allclose(y2, y2_ref, atol=6e-2, rtol=6e-2), err2   # bf16 intermediate

    print("KERNEL_OK")
</pallas_src>

<mosaic_0001>
module attributes {stable_mosaic.version = 11 : i64} {
  func.func @fused_conv_bn_act_kernel(%arg0: i32, %arg1: memref<128x128xbf16, #tpu.memory_space<vmem>>, %arg2: memref<128x128xbf16, #tpu.memory_space<vmem>>, %arg3: memref<1x128xf32, #tpu.memory_space<vmem>>, %arg4: memref<1x128xf32, #tpu.memory_space<vmem>>, %arg5: memref<128x128xf32, #tpu.memory_space<vmem>>, %arg6: memref<1x128xf32, #tpu.memory_space<vmem>>, %arg7: memref<1x128xf32, #tpu.memory_space<vmem>>) attributes {dimension_semantics = [#tpu.dimension_semantics<arbitrary>], iteration_bounds = array<i64: 1>, scalar_prefetch = 0 : i64, scratch_operands = 2 : i64, tpu.core_type = #tpu.core_type<tc>, window_params = [{transform_indices = @transform_0, window_bounds = array<i64: 128, 128>}, {pipeline_mode = #tpu.pipeline_mode<synchronous>, transform_indices = @transform_1, window_bounds = array<i64: 128, 128>}, {pipeline_mode = #tpu.pipeline_mode<synchronous>, transform_indices = @transform_2, window_bounds = array<i64: 1, 128>}, {pipeline_mode = #tpu.pipeline_mode<synchronous>, transform_indices = @transform_3, window_bounds = array<i64: 1, 128>}, {pipeline_mode = #tpu.pipeline_mode<synchronous>, transform_indices = @transform_4, window_bounds = array<i64: 128, 128>}]} {
    %c0_i32 = arith.constant 0 : i32
    %0 = arith.cmpi eq, %arg0, %c0_i32 : i32
    %1 = arith.extui %0 : i1 to i32
    %c0_i32_0 = arith.constant 0 : i32
    %2 = arith.cmpi ne, %1, %c0_i32_0 : i32
    scf.if %2 {
      %cst_17 = arith.constant 0.000000e+00 : f32
      %24 = vector.broadcast %cst_17 : f32 to vector<1x128xf32>
      %c0_18 = arith.constant 0 : index
      %c0_19 = arith.constant 0 : index
      %25 = vector.load %arg6[%c0_18, %c0_19] : memref<1x128xf32, #tpu.memory_space<vmem>>, vector<1x128xf32>
      tpu.vector_store %arg6[%c0_18, %c0_19], %24 {strides = array<i32>} : memref<1x128xf32, #tpu.memory_space<vmem>>, vector<1x128xf32>,
      %cst_20 = arith.constant 0.000000e+00 : f32
      %26 = vector.broadcast %cst_20 : f32 to vector<1x128xf32>
      %c0_21 = arith.constant 0 : index
      %c0_22 = arith.constant 0 : index
      %27 = vector.load %arg7[%c0_21, %c0_22] : memref<1x128xf32, #tpu.memory_space<vmem>>, vector<1x128xf32>
      tpu.vector_store %arg7[%c0_21, %c0_22], %26 {strides = array<i32>} : memref<1x128xf32, #tpu.memory_space<vmem>>, vector<1x128xf32>,
    } else {
    }
    %c0 = arith.constant 0 : index
    %c0_1 = arith.constant 0 : index
    %3 = vector.load %arg1[%c0, %c0_1] : memref<128x128xbf16, #tpu.memory_space<vmem>>, vector<128x128xbf16>
    %c0_2 = arith.constant 0 : index
    %c0_3 = arith.constant 0 : index
    %4 = vector.load %arg2[%c0_2, %c0_3] : memref<128x128xbf16, #tpu.memory_space<vmem>>, vector<128x128xbf16>
    %cst = arith.constant dense<0.000000e+00> : vector<128x128xf32>
    %5 = tpu.matmul %3, %4, %cst {dimension_numbers = #tpu.dot_dimension_numbers<[1], [0], [0], [1], [0, 0, 1, 1], [], []>} : vector<128x128xbf16>, vector<128x128xbf16>, vector<128x128xf32> -> vector<128x128xf32>
    %c128_i32 = arith.constant 128 : i32
    %6 = arith.muli %arg0, %c128_i32 : i32
    %7 = tpu.assume_multiple %6, 128 : i32
    %8 = arith.index_cast %7 : i32 to index
    %c0_4 = arith.constant 0 : index
    %9 = vector.load %arg5[%8, %c0_4] : memref<128x128xf32, #tpu.memory_space<vmem>>, vector<128x128xf32>
    tpu.vector_store %arg5[%8, %c0_4], %5 {strides = array<i32>} : memref<128x128xf32, #tpu.memory_space<vmem>>, vector<128x128xf32>,
    %c0_5 = arith.constant 0 : index
    %c0_6 = arith.constant 0 : index
    %10 = vector.load %arg6[%c0_5, %c0_6] : memref<1x128xf32, #tpu.memory_space<vmem>>, vector<1x128xf32>
    %cst_7 = arith.constant dense<0.000000e+00> : vector<128xf32>
    %11 = vector.multi_reduction <add>, %5, %cst_7 [0] : vector<128x128xf32> to vector<128xf32>
    %12 = vector.shape_cast %11 : vector<128xf32> to vector<1x128xf32>
    %13 = arith.addf %10, %12 : vector<1x128xf32>
    %c0_8 = arith.constant 0 : index
    %c0_9 = arith.constant 0 : index
    %14 = vector.load %arg6[%c0_8, %c0_9] : memref<1x128xf32, #tpu.memory_space<vmem>>, vector<1x128xf32>
    tpu.vector_store %arg6[%c0_8, %c0_9], %13 {strides = array<i32>} : memref<1x128xf32, #tpu.memory_space<vmem>>, vector<1x128xf32>,
    %c0_10 = arith.constant 0 : index
    %c0_11 = arith.constant 0 : index
    %15 = vector.load %arg7[%c0_10, %c0_11] : memref<1x128xf32, #tpu.memory_space<vmem>>, vector<1x128xf32>
    %16 = arith.mulf %5, %5 : vector<128x128xf32>
    %cst_12 = arith.constant dense<0.000000e+00> : vector<128xf32>
    %17 = vector.multi_reduction <add>, %16, %cst_12 [0] : vector<128x128xf32> to vector<128xf32>
    %18 = vector.shape_cast %17 : vector<128xf32> to vector<1x128xf32>
    %19 = arith.addf %15, %18 : vector<1x128xf32>
    %c0_13 = arith.constant 0 : index
    %c0_14 = arith.constant 0 : index
    %20 = vector.load %arg7[%c0_13, %c0_14] : memref<1x128xf32, #tpu.memory_space<vmem>>, vector<1x128xf32>
    tpu.vector_store %arg7[%c0_13, %c0_14], %19 {strides = array<i32>} : memref<1x128xf32, #tpu.memory_space<vmem>>, vector<1x128xf32>,
    %c0_i32_15 = arith.constant 0 : i32
    %21 = arith.cmpi eq, %arg0, %c0_i32_15 : i32
    %22 = arith.extui %21 : i1 to i32
    %c0_i32_16 = arith.constant 0 : i32
    %23 = arith.cmpi ne, %22, %c0_i32_16 : i32
    scf.if %23 {
      %c0_17 = arith.constant 0 : index
      %c0_18 = arith.constant 0 : index
      %24 = vector.load %arg6[%c0_17, %c0_18] : memref<1x128xf32, #tpu.memory_space<vmem>>, vector<1x128xf32>
      %cst_19 = arith.constant 7.812500e-03 : f32
      %25 = vector.broadcast %cst_19 : f32 to vector<1x128xf32>
      %26 = arith.mulf %24, %25 : vector<1x128xf32>
      %c0_20 = arith.constant 0 : index
      %c0_21 = arith.constant 0 : index
      %27 = vector.load %arg7[%c0_20, %c0_21] : memref<1x128xf32, #tpu.memory_space<vmem>>, vector<1x128xf32>
      %cst_22 = arith.constant 7.812500e-03 : f32
      %28 = vector.broadcast %cst_22 : f32 to vector<1x128xf32>
      %29 = arith.mulf %27, %28 : vector<1x128xf32>
      %30 = arith.mulf %26, %26 : vector<1x128xf32>
      %31 = arith.subf %29, %30 : vector<1x128xf32>
      %cst_23 = arith.constant 0.000000e+00 : f32
      %32 = vector.broadcast %cst_23 : f32 to vector<1x128xf32>
      %33 = arith.maximumf %31, %32 : vector<1x128xf32>
      %c0_24 = arith.constant 0 : index
      %c0_25 = arith.constant 0 : index
      %34 = vector.load %arg3[%c0_24, %c0_25] : memref<1x128xf32, #tpu.memory_space<vmem>>, vector<1x128xf32>
      %cst_26 = arith.constant 9.99999974E-6 : f32
      %35 = vector.broadcast %cst_26 : f32 to vector<1x128xf32>
      %36 = arith.addf %33, %35 : vector<1x128xf32>
      %37 = math.rsqrt %36 : vector<1x128xf32>
      %38 = arith.mulf %34, %37 : vector<1x128xf32>
      %c0_27 = arith.constant 0 : index
      %c0_28 = arith.constant 0 : index
      %39 = vector.load %arg4[%c0_27, %c0_28] : memref<1x128xf32, #tpu.memory_space<vmem>>, vector<1x128xf32>
      %40 = arith.mulf %26, %38 : vector<1x128xf32>
      %41 = arith.subf %39, %40 : vector<1x128xf32>
      %c0_i32_29 = arith.constant 0 : i32
      %c128_i32_30 = arith.constant 128 : i32
      %42 = arith.muli %c0_i32_29, %c128_i32_30 : i32
      %43 = tpu.assume_multiple %42, 128 : i32
      %44 = arith.index_cast %43 : i32 to index
      %c0_31 = arith.constant 0 : index
      %45 = vector.load %arg5[%44, %c0_31] : memref<128x128xf32, #tpu.memory_space<vmem>>, vector<128x128xf32>
      %46 = vector.broadcast %38 : vector<1x128xf32> to vector<128x128xf32>
      %47 = arith.mulf %45, %46 : vector<128x128xf32>
      %48 = vector.broadcast %41 : vector<1x128xf32> to vector<128x128xf32>
      %49 = arith.addf %47, %48 : vector<128x128xf32>
      %cst_32 = arith.constant 0.000000e+00 : f32
      %50 = vector.broadcast %cst_32 : f32 to vector<128x128xf32>
      %51 = arith.cmpf ogt, %49, %50 : vector<128x128xf32>
      %cst_33 = arith.constant 0.000000e+00 : f32
      %52 = vector.broadcast %cst_33 : f32 to vector<128x128xf32>
      %53 = arith.mulf %52, %49 : vector<128x128xf32>
      %54 = arith.select %51, %49, %53 : vector<128x128xi1>, vector<128x128xf32>
      %55 = arith.index_cast %43 : i32 to index
      %c0_34 = arith.constant 0 : index
      %56 = vector.load %arg5[%55, %c0_34] : memref<128x128xf32, #tpu.memory_space<vmem>>, vector<128x128xf32>
      tpu.vector_store %arg5[%55, %c0_34], %54 {strides = array<i32>} : memref<128x128xf32, #tpu.memory_space<vmem>>, vector<128x128xf32>,
      %c1_i32 = arith.constant 1 : i32
    } else {
    }
    return
  }
  func.func @transform_0(%arg0: i32) -> (i32, i32) {
    %c0_i32 = arith.constant 0 : i32
    %c0_i32_0 = arith.constant 0 : i32
    return %arg0, %c0_i32 : i32, i32
  }
  func.func @transform_1(%arg0: i32) -> (i32, i32) {
    %c0_i32 = arith.constant 0 : i32
    %c0_i32_0 = arith.constant 0 : i32
    %c0_i32_1 = arith.constant 0 : i32
    return %c0_i32, %c0_i32_0 : i32, i32
  }
  func.func @transform_2(%arg0: i32) -> (i32, i32) {
    %c0_i32 = arith.constant 0 : i32
    %c0_i32_0 = arith.constant 0 : i32
    %c0_i32_1 = arith.constant 0 : i32
    return %c0_i32, %c0_i32_0 : i32, i32
  }
  func.func @transform_3(%arg0: i32) -> (i32, i32) {
    %c0_i32 = arith.constant 0 : i32
    %c0_i32_0 = arith.constant 0 : i32
    %c0_i32_1 = arith.constant 0 : i32
    return %c0_i32, %c0_i32_0 : i32, i32
  }
  func.func @transform_4(%arg0: i32) -> (i32, i32) {
    %c0_i32 = arith.constant 0 : i32
    %c0_i32_0 = arith.constant 0 : i32
    %c0_i32_1 = arith.constant 0 : i32
    return %c0_i32, %c0_i32_0 : i32, i32
  }
}

</mosaic_0001>

<bundles_post_ra>
// kernel: gen_unit_forward.1
= control target key start
LH: loop header
LB: loop body
LE: loop exit
PB: predicated region body
PF: predicated region fallthrough
CT: control target
= control target key end

     0   :  { %v575_v16 = vmov 0.0   ;;  %s815_s1 = inlined_call_operand.vmem [shape: bf16[128,128], index: 1, kind: input, shape index: {}]   ;;  %s816_s0 = inlined_call_operand.vmem [shape: bf16[128,128], index: 0, kind: input, shape index: {}]   ;;  %s817_s2 = inlined_call_operand.vmem [shape: f32[1,128], index: 2, kind: input, shape index: {}]   ;;  %s818_s3 = inlined_call_operand.vmem [shape: f32[1,128], index: 3, kind: input, shape index: {}]   ;;  %s819_s4 = inlined_call_operand.vmem [shape: f32[128,128], index: 4, kind: output, shape index: {}]  }
   0x1   :  { %v557_v0 = vld [vmem:[%s815_s1 + $0x38] sm:$0xff]   ;;  %v558_v1 = vld [vmem:[%s815_s1 + $0x30] sm:$0xff]   ;;  %v559_v2 = vld [vmem:[%s815_s1 + $0x28] sm:$0xff]   ;;  %22 = vst [vmem:[#allocation2] sm:$0x1] %v575_v16 }
   0x2   :  { %508 = vmatprep.subr.bf16.mxu0 %v557_v0  ;;  %540 = vmatprep.subr.bf16.mxu1 %v557_v0  ;;  %v560_v3 = vld [vmem:[%s815_s1 + $0x20] sm:$0xff]   ;;  %v561_v5 = vld [vmem:[%s815_s1 + $0x18] sm:$0xff]   ;;  %v562_v7 = vld [vmem:[%s815_s1 + $0x10] sm:$0xff]   ;;  %23 = vst [vmem:[#allocation3] sm:$0x1] %v575_v16 }
   0x3   :  { %509 = vmatpush3.bf16.msra.mxu0 %v557_v0  ;;  %548 = vmatpush3.bf16.msra.mxu1 %v557_v0  ;;  %v565_v4 = vld [vmem:[%s816_s0] sm:$0xff]   ;;  %v563_v8 = vld [vmem:[%s815_s1 + $0x8] sm:$0xff]   ;;  %v567_v12 = vld [vmem:[%s816_s0 + $0x10] sm:$0xff]  }
   0x4   :  { %510 = vmatprep.subr.bf16.mxu0 %v558_v1  ;;  %541 = vmatprep.subr.bf16.mxu1 %v558_v1  ;;  %v569_v6 = vld [vmem:[%s816_s0 + $0x20] sm:$0xff]   ;;  %v566_v10 = vld [vmem:[%s816_s0 + $0x8] sm:$0xff]   ;;  %v571_v13 = vld [vmem:[%s816_s0 + $0x30] sm:$0xff]  }
   0x5   :  { %524 = vmatprep.mubr.bf16.mxu0 %v565_v4  ;;  %532 = vmatprep.mubr.bf16.mxu1 %v569_v6  ;;  %v564_v9 = vld [vmem:[%s815_s1] sm:$0xff]   ;;  %v570_v11 = vld [vmem:[%s816_s0 + $0x28] sm:$0xff]   ;;  %v568_v14 = vld [vmem:[%s816_s0 + $0x18] sm:$0xff]  }
   0x6   :  { %v572_v15 = vld [vmem:[%s816_s0 + $0x38] sm:$0xff]  }
   0x7   :  { %511 = vmatpush3.bf16.msra.mxu0 %v558_v1  ;;  %549 = vmatpush3.bf16.msra.mxu1 %v558_v1 }
   0x8   :  { %512 = vmatprep.subr.bf16.mxu0 %v559_v2  ;;  %542 = vmatprep.subr.bf16.mxu1 %v559_v2 }
   0xb   :  { %513 = vmatpush3.bf16.msra.mxu0 %v559_v2  ;;  %550 = vmatpush3.bf16.msra.mxu1 %v559_v2 }
   0xc   :  { %514 = vmatprep.subr.bf16.mxu0 %v560_v3  ;;  %543 = vmatprep.subr.bf16.mxu1 %v560_v3 }
   0xf   :  { %515 = vmatpush3.bf16.msra.mxu0 %v560_v3  ;;  %551 = vmatpush3.bf16.msra.mxu1 %v560_v3 }
  0x10   :  { %516 = vmatprep.subr.bf16.mxu0 %v561_v5  ;;  %544 = vmatprep.subr.bf16.mxu1 %v561_v5 }
  0x13   :  { %517 = vmatpush3.bf16.msra.mxu0 %v561_v5  ;;  %552 = vmatpush3.bf16.msra.mxu1 %v561_v5 }
  0x14   :  { %518 = vmatprep.subr.bf16.mxu0 %v562_v7  ;;  %545 = vmatprep.subr.bf16.mxu1 %v562_v7 }
  0x17   :  { %519 = vmatpush3.bf16.msra.mxu0 %v562_v7  ;;  %553 = vmatpush3.bf16.msra.mxu1 %v562_v7 }
  0x18   :  { %520 = vmatprep.subr.bf16.mxu0 %v563_v8  ;;  %546 = vmatprep.subr.bf16.mxu1 %v563_v8 }
  0x1b   :  { %521 = vmatpush3.bf16.msra.mxu0 %v563_v8  ;;  %554 = vmatpush3.bf16.msra.mxu1 %v563_v8 }
  0x1c   :  { %522 = vmatprep.subr.bf16.mxu0 %v564_v9  ;;  %547 = vmatprep.subr.bf16.mxu1 %v564_v9 }
  0x1f   :  { %523 = vmatpush3.bf16.msra.mxu0 %v564_v9  ;;  %555 = vmatpush3.bf16.msra.mxu1 %v564_v9 }
  0x22   :  { %525 = vmatmul.mubr.bf16.vlgmr.msra.gmra.mxu0 %v566_v10  ;;  %533 = vmatmul.mubr.bf16.vlgmr.msra.gmra.mxu1 %v570_v11 }
  0x23   :  { %528 = vmatprep.mubr.bf16.mxu0 %v567_v12  ;;  %536 = vmatprep.mubr.bf16.mxu1 %v571_v13 }
  0x2a   :  { %529 = vmatmul.mubr.bf16.gmra.mxu0 %v568_v14  ;;  %537 = vmatmul.mubr.bf16.gmra.mxu1 %v572_v15 }
  0xe2   :  { %v649_v17 = vpop.f32.mrf.mxu0  ;;  %v651_v18 = vpop.f32.mrf.mxu1 }
  0xe3   :  { %v294_v28 = vmul.f32 %v649_v17, %v649_v17  ;;  %v302_v59 = vmul.f32 %v651_v18, %v651_v18 }
  0xe4   :  { %v653_v19 = vpop.f32.mrf.mxu0  ;;  %v657_v21 = vpop.f32.mrf.mxu1 }
  0xe5   :  { %v292_v23 = vmul.f32 %v653_v19, %v653_v19  ;;  %v300_v52 = vmul.f32 %v657_v21, %v657_v21 }
  0xe6   :  { %v655_v20 = vpop.f32.mrf.mxu0  ;;  %v669_v27 = vpop.f32.mrf.mxu1 }
  0xe7   :  { %v295_v32 = vmul.f32 %v655_v20, %v655_v20  ;;  %v303_v62 = vmul.f32 %v669_v27, %v669_v27 }
  0xe8   :  { %v659_v22 = vpop.f32.mrf.mxu0  ;;  %v681_v36 = vpop.f32.mrf.mxu1 }
  0xe9   :  { %v268_v24 = vadd.f32 %v659_v22, %v653_v19  ;;  %v293_v25 = vmul.f32 %v659_v22, %v659_v22  ;;  %v301_v56 = vmul.f32 %v681_v36, %v681_v36 }
  0xea   :  { %v667_v26 = vpop.f32.mrf.mxu0  ;;  %v691_v44 = vpop.f32.mrf.mxu1 }
  0xeb   :  { %v269_v29 = vadd.f32 %v649_v17, %v268_v24  ;;  %v308_v30 = vadd.f32 %v293_v25, %v292_v23  ;;  %v298_v45 = vmul.f32 %v667_v26, %v667_v26  ;;  %v306_v8 = vmul.f32 %v691_v44, %v691_v44 }
  0xec   :  { %v674_v31 = vpop.f32.mrf.mxu0  ;;  %v699_v51 = vpop.f32.mrf.mxu1 }
  0xed   :  { %v309_v33 = vadd.f32 %v308_v30, %v294_v28  ;;  %v270_v34 = vadd.f32 %v655_v20, %v269_v29  ;;  %v296_v38 = vmul.f32 %v674_v31, %v674_v31  ;;  %v304_v3 = vmul.f32 %v699_v51, %v699_v51 }
  0xee   :  { %v679_v35 = vpop.f32.mrf.mxu0  ;;  %v707_v58 = vpop.f32.mrf.mxu1 }
  0xef   :  { %v271_v37 = vadd.f32 %v270_v34, %v674_v31  ;;  %v310_v39 = vadd.f32 %v309_v33, %v295_v32  ;;  %v299_v48 = vmul.f32 %v679_v35, %v679_v35  ;;  %v307_v11 = vmul.f32 %v707_v58, %v707_v58  ;;  %v267_v33 = vld [vmem:[#allocation2] sm:$0x1] }
  0xf0   :  { %v686_v40 = vpop.f32.mrf.mxu0  ;;  %v715_v1 = vpop.f32.mrf.mxu1 }
  0xf1   :  { %v311_v41 = vadd.f32 %v310_v39, %v296_v38  ;;  %v272_v42 = vadd.f32 %v271_v37, %v686_v40  ;;  %v297_v43 = vmul.f32 %v686_v40, %v686_v40  ;;  %v305_v7 = vmul.f32 %v715_v1, %v715_v1  ;;  %v291_v38 = vld [vmem:[#allocation3] sm:$0x1] }
  0xf3   :  { %v273_v46 = vadd.f32 %v667_v26, %v272_v42  ;;  %v312_v47 = vadd.f32 %v311_v41, %v297_v43 }
  0xf5   :  { %v274_v49 = vadd.f32 %v679_v35, %v273_v46  ;;  %v313_v50 = vadd.f32 %v312_v47, %v298_v45 }
  0xf7   :  { %v314_v53 = vadd.f32 %v313_v50, %v299_v48  ;;  %v275_v54 = vadd.f32 %v274_v49, %v657_v21 }
  0xf9   :  { %v276_v55 = vadd.f32 %v275_v54, %v681_v36  ;;  %v315_v57 = vadd.f32 %v314_v53, %v300_v52  ;;  %v365_v53 = vlaneseq }
  0xfb   :  { %v277_v60 = vadd.f32 %v651_v18, %v276_v55  ;;  %v316_v61 = vadd.f32 %v315_v57, %v301_v56  ;;  %v366_v54 = vshrl.u32 %v365_v53, 7  ;;  %v341_v55 = vld [vmem:[%s817_s2] sm:$0x1] }
  0xfd   :  { %v317_v63 = vadd.f32 %v316_v61, %v302_v59  ;;  %v278_v0 = vadd.f32 %v669_v27, %v277_v60  ;;  %v367_v56 = vsub.s32 0, %v366_v54  ;;  %v345_v60 = vld [vmem:[%s818_s3] sm:$0x1] }
  0xff   :  { %v279_v2 = vadd.f32 %v278_v0, %v699_v51  ;;  %v318_v4 = vadd.f32 %v317_v63, %v303_v62 }
 0x101   :  { %v319_v5 = vadd.f32 %v318_v4, %v304_v3  ;;  %v280_v6 = vadd.f32 %v279_v2, %v715_v1 }
 0x103   :  { %v281_v9 = vadd.f32 %v691_v44, %v280_v6  ;;  %v320_v10 = vadd.f32 %v319_v5, %v305_v7 }
 0x105   :  { %v282_v12 = vadd.f32 %v707_v58, %v281_v9  ;;  %v321_v13 = vadd.f32 %v320_v10, %v306_v8 }
 0x107   :  { %v283_v14 = vrot.slane %v282_v12, 4  ;;  %v322_v15 = vadd.f32 %v321_v13, %v307_v11 }
 0x109   :  { %v284_v16 = vadd.f32 %v283_v14, %v282_v12  ;;  %v323_v23 = vrot.slane %v322_v15, 4 }
 0x10b   :  { %v285_v24 = vrot.slane %v284_v16, 2  ;;  %v324_v25 = vadd.f32 %v323_v23, %v322_v15 }
 0x10d   :  { %v286_v28 = vadd.f32 %v285_v24, %v284_v16  ;;  %v325_v29 = vrot.slane %v324_v25, 2 }
 0x10f   :  { %v287_v30 = vrot.slane %v286_v28, 1  ;;  %v326_v32 = vadd.f32 %v325_v29, %v324_v25 }
 0x111   :  { %v288_v34 = vadd.f32 %v287_v30, %v286_v28  ;;  %v327_v37 = vrot.slane %v326_v32, 1 }
 0x113   :  { %v289_v39 = vadd.f32 %v288_v34, %v267_v33  ;;  %v328_v41 = vadd.f32 %v327_v37, %v326_v32 }
 0x115   :  { %290 = vst [vmem:[#allocation2] sm:$0x1] %v289_v39  ;;  %v329_v42 = vadd.f32 %v328_v41, %v291_v38 }
 0x117   :  { %330 = vst [vmem:[#allocation3] sm:$0x1] %v329_v42 }
 0x11c   :  { %v334_v43 = vld [vmem:[#allocation2] sm:$0x1] }
 0x11d   :  { %v335_v45 = vmul.f32 0.0078125, %v334_v43 }
 0x11e   :  { %v336_v46 = vld [vmem:[#allocation3] sm:$0x1] }
 0x11f   :  { %v337_v47 = vmul.f32 0.0078125, %v336_v46  ;;  %v338_v48 = vmul.f32 %v335_v45, %v335_v45 }
 0x121   :  { %v339_v49 = vsub.f32 %v337_v47, %v338_v48 }
 0x123   :  { %v340_v50 = vmax.f32 %v339_v49, 0.0 }
 0x125   :  { %v342_v52 = vadd.f32 1e-05, %v340_v50 }
 0x127   :  { %573 = vrsqrt.f32 %v342_v52 }
 0x134   :  { %v574_v57 = vpop.eup %573 }
 0x135   :  { %v344_v59 = vmul.f32 %v574_v57, %v341_v55 }
 0x137   :  { %v346_v61 = vmul.f32 %v344_v59, %v335_v45  ;;  %v368_v62 = vrot.slane %v344_v59, %v367_v56 }
 0x139   :  { %v347_v63 = vsub.f32 %v345_v60, %v346_v61  ;;  %v370_v0 = vmul.f32 %v368_v62, %v653_v19  ;;  %v371_v2 = vmul.f32 %v368_v62, %v659_v22  ;;  %v372_v3 = vmul.f32 %v649_v17, %v368_v62 }
 0x13a   :  { %v373_v4 = vmul.f32 %v655_v20, %v368_v62  ;;  %v374_v5 = vmul.f32 %v368_v62, %v674_v31  ;;  %v375_v6 = vmul.f32 %v368_v62, %v686_v40  ;;  %v376_v7 = vmul.f32 %v667_v26, %v368_v62 }
 0x13b   :  { %v377_v8 = vmul.f32 %v679_v35, %v368_v62  ;;  %v378_v9 = vmul.f32 %v368_v62, %v657_v21  ;;  %v379_v10 = vmul.f32 %v368_v62, %v681_v36  ;;  %v380_v19 = vmul.f32 %v651_v18, %v368_v62 }
 0x13c   :  { %v381_v22 = vmul.f32 %v669_v27, %v368_v62  ;;  %v390_v11 = vrot.slane %v347_v63, %v367_v56  ;;  %v382_v17 = vmul.f32 %v368_v62, %v699_v51  ;;  %v383_v20 = vmul.f32 %v368_v62, %v715_v1 }
 0x13d   :  { %v384_v31 = vmul.f32 %v691_v44, %v368_v62  ;;  %v385_v40 = vmul.f32 %v707_v58, %v368_v62 }
 0x13e   :  { %v392_v26 = vadd.f32 %v390_v11, %v370_v0  ;;  %v393_v12 = vadd.f32 %v390_v11, %v371_v2  ;;  %v394_v35 = vadd.f32 %v390_v11, %v372_v3  ;;  %v395_v13 = vadd.f32 %v390_v11, %v373_v4 }
 0x13f   :  { %v396_v21 = vadd.f32 %v390_v11, %v374_v5  ;;  %v397_v14 = vadd.f32 %v390_v11, %v375_v6  ;;  %v398_v36 = vadd.f32 %v390_v11, %v376_v7  ;;  %v399_v15 = vadd.f32 %v390_v11, %v377_v8 }
 0x140   :  { %v400_v18 = vadd.f32 %v390_v11, %v378_v9  ;;  %v401_v16 = vadd.f32 %v390_v11, %v379_v10  ;;  %v402_v27 = vadd.f32 %v390_v11, %v380_v19  ;;  %v403_v23 = vadd.f32 %v390_v11, %v381_v22 }
 0x141   :  { %v404_v24 = vadd.f32 %v390_v11, %v382_v17  ;;  %v405_v51 = vadd.f32 %v390_v11, %v383_v20  ;;  %v406_v25 = vadd.f32 %v390_v11, %v384_v31  ;;  %v407_v1 = vadd.f32 %v390_v11, %v385_v40 }
 0x142   :  { %vm408_vm0 = vcmp.gt.f32.partialorder %v392_v26, 0.0  ;;  %vm409_vm1 = vcmp.gt.f32.partialorder %v393_v12, 0.0  ;;  %vm410_vm2 = vcmp.gt.f32.partialorder %v394_v35, 0.0  ;;  %vm411_vm3 = vcmp.gt.f32.partialorder %v395_v13, 0.0 }
 0x143   :  { %vm412_vm4 = vcmp.gt.f32.partialorder %v396_v21, 0.0  ;;  %vm413_vm5 = vcmp.gt.f32.partialorder %v397_v14, 0.0  ;;  %vm414_vm6 = vcmp.gt.f32.partialorder %v398_v36, 0.0  ;;  %vm415_vm7 = vcmp.gt.f32.partialorder %v399_v15, 0.0 }
 0x144   :  { %vm416_vm8 = vcmp.gt.f32.partialorder %v400_v18, 0.0  ;;  %vm417_vm9 = vcmp.gt.f32.partialorder %v401_v16, 0.0  ;;  %vm418_vm10 = vcmp.gt.f32.partialorder %v402_v27, 0.0  ;;  %vm419_vm11 = vcmp.gt.f32.partialorder %v403_v23, 0.0 }
 0x145   :  { %vm420_vm12 = vcmp.gt.f32.partialorder %v404_v24, 0.0  ;;  %vm421_vm13 = vcmp.gt.f32.partialorder %v405_v51, 0.0  ;;  %vm422_vm14 = vcmp.gt.f32.partialorder %v406_v25, 0.0  ;;  %vm423_vm15 = vcmp.gt.f32.partialorder %v407_v1, 0.0 }
 0x146   :  { %v424_v44 = vmul.f32 0.0, %v392_v26  ;;  %v425_v58 = vmul.f32 0.0, %v393_v12  ;;  %v426_v28 = vmul.f32 0.0, %v394_v35  ;;  %v427_v29 = vmul.f32 0.0, %v395_v13 }
 0x147   :  { %v428_v30 = vmul.f32 0.0, %v396_v21  ;;  %v429_v32 = vmul.f32 0.0, %v397_v14  ;;  %v430_v33 = vmul.f32 0.0, %v398_v36  ;;  %v431_v34 = vmul.f32 0.0, %v399_v15 }
 0x148   :  { %v432_v37 = vmul.f32 0.0, %v400_v18  ;;  %v433_v38 = vmul.f32 0.0, %v401_v16  ;;  %v434_v39 = vmul.f32 0.0, %v402_v27  ;;  %v435_v41 = vmul.f32 0.0, %v403_v23 }
 0x149   :  { %v436_v42 = vmul.f32 0.0, %v404_v24  ;;  %v437_v43 = vmul.f32 0.0, %v405_v51  ;;  %v438_v45 = vmul.f32 0.0, %v406_v25  ;;  %v439_v46 = vmul.f32 0.0, %v407_v1 }
 0x14a   :  { %v440_v47 = vsel %vm408_vm0, %v392_v26, %v424_v44  ;;  %v441_v48 = vsel %vm409_vm1, %v393_v12, %v425_v58  ;;  %v442_v49 = vsel %vm410_vm2, %v394_v35, %v426_v28  ;;  %v443_v50 = vsel %vm411_vm3, %v395_v13, %v427_v29 }
 0x14b   :  { %v444_v52 = vsel %vm412_vm4, %v396_v21, %v428_v30  ;;  %v445_v53 = vsel %vm413_vm5, %v397_v14, %v429_v32  ;;  %v446_v54 = vsel %vm414_vm6, %v398_v36, %v430_v33  ;;  %v447_v55 = vsel %vm415_vm7, %v399_v15, %v431_v34  ;;  %456 = vst [vmem:[%s819_s4] sm:$0xff] %v440_v47 }
 0x14c   :  { %457 = vst [vmem:[%s819_s4 + $0x8] sm:$0xff] %v441_v48  ;;  %458 = vst [vmem:[%s819_s4 + $0x10] sm:$0xff] %v442_v49  ;;  %v448_v56 = vsel %vm416_vm8, %v400_v18, %v432_v37  ;;  %v449_v57 = vsel %vm417_vm9, %v401_v16, %v433_v38  ;;  %v450_v59 = vsel %vm418_vm10, %v402_v27, %v434_v39 }
 0x14d   :  { %459 = vst [vmem:[%s819_s4 + $0x18] sm:$0xff] %v443_v50  ;;  %v451_v60 = vsel %vm419_vm11, %v403_v23, %v435_v41  ;;  %460 = vst [vmem:[%s819_s4 + $0x20] sm:$0xff] %v444_v52  ;;  %v452_v61 = vsel %vm420_vm12, %v404_v24, %v436_v42  ;;  %v453_v62 = vsel %vm421_vm13, %v405_v51, %v437_v43 }
 0x14e   :  { %461 = vst [vmem:[%s819_s4 + $0x28] sm:$0xff] %v445_v53  ;;  %462 = vst [vmem:[%s819_s4 + $0x30] sm:$0xff] %v446_v54  ;;  %v454_v63 = vsel %vm422_vm14, %v406_v25, %v438_v45  ;;  %v455_v0 = vsel %vm423_vm15, %v407_v1, %v439_v46 }
 0x14f   :  { %463 = vst [vmem:[%s819_s4 + $0x38] sm:$0xff] %v447_v55  ;;  %464 = vst [vmem:[%s819_s4 + $0x40] sm:$0xff] %v448_v56 }
 0x150   :  { %465 = vst [vmem:[%s819_s4 + $0x48] sm:$0xff] %v449_v57  ;;  %466 = vst [vmem:[%s819_s4 + $0x50] sm:$0xff] %v450_v59 }
 0x151   :  { %467 = vst [vmem:[%s819_s4 + $0x58] sm:$0xff] %v451_v60  ;;  %468 = vst [vmem:[%s819_s4 + $0x60] sm:$0xff] %v452_v61 }
 0x152   :  { %469 = vst [vmem:[%s819_s4 + $0x68] sm:$0xff] %v453_v62  ;;  %470 = vst [vmem:[%s819_s4 + $0x70] sm:$0xff] %v454_v63 }
 0x153   :  { %471 = vst [vmem:[%s819_s4 + $0x78] sm:$0xff] %v455_v0 }

</bundles_post_ra>
